<compile_context>
chip_gen: v7x
topology: tpu7x:2x2x1
jax: 0.10.0
libtpu: 0.0.40
codegen_flags: <defaults>
</compile_context>

<pallas_src>
import math

import jax
import jax.numpy as jnp
from jax.experimental import pallas as pl
from jax.experimental.pallas import tpu as pltpu


# -----------------------------------------------------------------------------
# Generation-aware VMEM budgeting (layout-padded footprint model).
# -----------------------------------------------------------------------------
def _vmem_budget_and_limit():
    """Returns (budget bytes for our own tile accounting, scoped-vmem limit)."""
    try:
        cap = int(pltpu.get_tpu_info().vmem_capacity_bytes)
    except Exception:
        cap = 64 * 1024 * 1024          # conservative fallback (v7x-sized VMEM)
    if cap <= 64 * 1024 * 1024:
        # v7x-class parts: 64 MiB is a hard ceiling shared with Mosaic internals.
        limit = min(30 * 1024 * 1024, (cap * 3) // 4)
    else:
        # v5e / v6e (128 MiB): scale with capacity instead of capping at 48 MiB.
        limit = min((cap * 7) // 10, 96 * 1024 * 1024)
    budget = (limit * 3) // 4           # headroom for Mosaic internals
    return budget, limit


def _padded_bytes(rows, lanes, itemsize):
    """VMEM bytes of a (rows, lanes) tile including (sublane, 128-lane) padding."""
    sub = 8 * (4 // itemsize)           # f32 -> 8 sublanes/tile, bf16 -> 16
    rows_p = -(-rows // sub) * sub
    lanes_p = -(-lanes // 128) * 128
    return rows_p * lanes_p * itemsize


def _step_bytes(TH, n_t, Wp, Wo, Cin, Cout, KH, has_add, itemsize_in):
    """Per-grid-step VMEM footprint (layout padded, double-buffered inputs)."""
    halo = KH - 1
    has_halo = (n_t > 1) and (halo > 0)
    main_rows = TH if has_halo else TH + halo
    wc_in, wc_out = Wp * Cin, Wo * Cout
    b = 2 * _padded_bytes(main_rows, wc_in, itemsize_in)        # main input rows
    if has_halo:
        b += 2 * _padded_bytes(8, wc_in, itemsize_in)           # 8-row halo block
    b += 2 * KH * _padded_bytes(wc_in, wc_out, itemsize_in)     # banded weights
    b += 2 * _padded_bytes(TH, wc_out, 4)                       # f32 output block
    if has_add:
        b += 2 * _padded_bytes(TH, wc_out, itemsize_in)         # fused addend
    b += _padded_bytes(TH, wc_out, 4)                           # f32 accumulator
    return b


_ALIGN = 8  # row-tile alignment: sublane tile + 8-row halo-block divisibility


def _pick_tile_h(Ho, Wp, Wo, Cin, Cout, KH, has_add, budget, itemsize_in, batch):
    halo = KH - 1

    def fits(th, n_t):
        return _step_bytes(th, n_t, Wp, Wo, Cin, Cout, KH, has_add,
                           itemsize_in) <= budget

    if fits(Ho, 1):
        # Whole image per step.  If the batch alone cannot feed two TensorCores
        # (v7x megacore), split the rows once so both cores get work.
        if (batch < 2 and Ho % (2 * _ALIGN) == 0 and halo <= _ALIGN
                and fits(Ho // 2, 2)):
            return Ho // 2, 2
        return Ho, 1
    if Ho < 2 * _ALIGN or halo > _ALIGN:
        return Ho, 1                     # too small / halo too tall to tile
    best = None
    cand = (Ho // _ALIGN) * _ALIGN
    while cand >= _ALIGN:
        if fits(cand, -(-Ho // cand)):
            best = cand
            break
        cand -= _ALIGN
    if best is None:
        best = _ALIGN                    # best effort; scoped limit is raised
    # Prefer a (not much smaller) tile that divides Ho: avoids the output
    # over-allocation and the post-call slice entirely.
    d = best
    while d >= max(_ALIGN, best // 2):
        if Ho % d == 0 and fits(d, Ho // d):
            return d, Ho // d
        d -= _ALIGN
    return best, -(-Ho // best)


# -----------------------------------------------------------------------------
# Banded ("Toeplitz") weight: conv becomes KH lane-dense matmuls per row tile.
#   M_ky[win*Cin + ci, wo*Cout + co] = W[ky, win - wo, ci, co]  (0 <= win-wo < KW)
# -----------------------------------------------------------------------------
def _banded_weights(w_hwio, Wp, Wo, dtype):
    KH, KW, Cin, Cout = w_hwio.shape
    w32 = w_hwio.astype(jnp.float32)
    mats = []
    for ky in range(KH):
        m = jnp.zeros((Wp * Cin, Wo * Cout), jnp.float32)
        for kx in range(KW):
            band = jnp.eye(Wp, Wo, k=-kx, dtype=jnp.float32)
            m = m + jnp.kron(band, w32[ky, kx])
        mats.append(m)
    return jnp.stack(mats).astype(dtype)            # (KH, Wp*Cin, Wo*Cout)


# -----------------------------------------------------------------------------
# Pallas conv2d kernel (stride 1, dilation 1, groups 1, no bias) with an
# optional fused elementwise addend on the output.
# -----------------------------------------------------------------------------
def conv2d_pallas(x_nhwc, w_hwio, padding, addend=None, tile_h_override=None,
                  compute_dtype=jnp.bfloat16):
    """x_nhwc: (B, H, W, Cin); w_hwio: (KH, KW, Cin, Cout).

    Returns (B, Ho, Wo, Cout), Ho = H + 2*padding - KH + 1 (stride 1).  If
    `addend` (same shape as the output) is given, it is added inside the kernel
    (fuses the x_h2h + x_l2h / x_h2l + x_l2l additions).
    """
    B, H, W, Cin = x_nhwc.shape
    KH, KW, Cin2, Cout = w_hwio.shape
    assert Cin == Cin2
    assert KH <= 9, "halo handling assumes KH - 1 <= 8"
    Hp, Wp = H + 2 * padding, W + 2 * padding
    Ho, Wo = Hp - KH + 1, Wp - KW + 1
    assert Ho > 0 and Wo > 0
    wc_in, wc_out = Wp * Cin, Wo * Cout
    out_dtype = x_nhwc.dtype
    has_add = addend is not None
    if has_add:
        assert addend.shape == (B, Ho, Wo, Cout), (addend.shape, (B, Ho, Wo, Cout))
    itemsize_in = jnp.dtype(compute_dtype).itemsize

    budget, vmem_limit = _vmem_budget_and_limit()
    if tile_h_override is not None:
        TH = min(int(tile_h_override), Ho)
        n_t = -(-Ho // TH)
        if n_t > 1:
            assert TH % _ALIGN == 0, "tile_h_override must be a multiple of 8"
    else:
        TH, n_t = _pick_tile_h(Ho, Wp, Wo, Cin, Cout, KH, has_add, budget,
                               itemsize_in, B)

    Ho_pad = TH * n_t
    halo = KH - 1
    has_halo = (n_t > 1) and (halo > 0)
    main_rows = TH if has_halo else TH + halo

    # Rows needed: Ho_pad + KH - 1 for the conv windows, plus slack so the fixed
    # 8-row halo block of the last tile stays in bounds.
    extra_rows = (8 - halo) if has_halo else 0
    pad_bottom = padding + (Ho_pad - Ho) + extra_rows

    # One fused pass: conv pad + tile pad + bf16 cast + lane-dense flatten.
    xp = jnp.pad(x_nhwc.astype(compute_dtype),
                 ((0, 0), (padding, pad_bottom), (padding, padding), (0, 0)))
    xp = xp.reshape(B, xp.shape[1], wc_in)

    w_band = _banded_weights(w_hwio, Wp, Wo, compute_dtype)   # (KH, wc_in, wc_out)

    a_flat = None
    if has_add:
        a_flat = addend.astype(compute_dtype).reshape(B, Ho, wc_out)
        if Ho_pad != Ho:
            a_flat = jnp.pad(a_flat, ((0, 0), (0, Ho_pad - Ho), (0, 0)))

    def kernel(*refs):
        i = 0
        main_ref = refs[i]; i += 1
        halo_ref = None
        if has_halo:
            halo_ref = refs[i]; i += 1
        w_ref = refs[i]; i += 1
        a_ref = None
        if has_add:
            a_ref = refs[i]; i += 1
        o_ref = refs[i]; i += 1
        acc_ref = refs[i]

        # ky = 0: initialize the f32 accumulator (all TH rows come from main).
        acc_ref[...] = jnp.dot(main_ref[0, 0:TH, :], w_ref[0],
                               preferred_element_type=jnp.float32)
        # ky > 0: accumulate; with a halo the last `ky` rows come from halo_ref.
        for ky in range(1, KH):
            if has_halo:
                nm = TH - ky
                if nm > 0:
                    acc_ref[0:nm, :] += jnp.dot(
                        main_ref[0, ky:TH, :], w_ref[ky],
                        preferred_element_type=jnp.float32)
                acc_ref[nm:TH, :] += jnp.dot(
                    halo_ref[0, 0:ky, :], w_ref[ky],
                    preferred_element_type=jnp.float32)
            else:
                acc_ref[...] += jnp.dot(main_ref[0, ky:ky + TH, :], w_ref[ky],
                                        preferred_element_type=jnp.float32)
        out = acc_ref[...]
        if has_add:
            out = out + a_ref[0].astype(jnp.float32)
        o_ref[0] = out.astype(o_ref.dtype)          # lane-dense (TH, Wo*Cout) store

    # --- BlockSpecs (all lane-dense: last block dim == full flattened dim) ----
    in_specs = [pl.BlockSpec((1, main_rows, wc_in), lambda b, t: (b, t, 0))]
    args = [xp]
    if has_halo:
        halo_stride = TH // 8            # TH is a multiple of 8
        in_specs.append(pl.BlockSpec(
            (1, 8, wc_in), lambda b, t: (b, (t + 1) * halo_stride, 0)))
        args.append(xp)
    in_specs.append(pl.BlockSpec((KH, wc_in, wc_out), lambda b, t: (0, 0, 0)))
    args.append(w_band)
    if has_add:
        in_specs.append(pl.BlockSpec((1, TH, wc_out), lambda b, t: (b, t, 0)))
        args.append(a_flat)

    out_spec = pl.BlockSpec((1, TH, wc_out), lambda b, t: (b, t, 0))

    flops = 2 * B * Ho_pad * KH * wc_in * wc_out
    bytes_accessed = (xp.size * itemsize_in
                      + w_band.size * itemsize_in
                      + (a_flat.size * itemsize_in if has_add else 0)
                      + B * Ho_pad * wc_out * jnp.dtype(out_dtype).itemsize)
    cost = pl.CostEstimate(flops=int(flops), transcendentals=0,
                           bytes_accessed=int(bytes_accessed))

    out_flat = pl.pallas_call(
        kernel,
        out_shape=jax.ShapeDtypeStruct((B, Ho_pad, wc_out), out_dtype),
        grid=(B, n_t),
        in_specs=in_specs,
        out_specs=out_spec,
        scratch_shapes=[pltpu.VMEM((TH, wc_out), jnp.float32)],
        compiler_params=pltpu.CompilerParams(
            dimension_semantics=("parallel", "parallel"),
            vmem_limit_bytes=int(vmem_limit)),
        cost_estimate=cost,
    )(*args)

    out = out_flat if Ho_pad == Ho else out_flat[:, :Ho]
    return out.reshape(B, Ho, Wo, Cout)


# -----------------------------------------------------------------------------
# Cheap data-movement glue in plain JAX (NHWC).
# -----------------------------------------------------------------------------
def avgpool2_nhwc(x):
    B, H, W, C = x.shape
    return x.reshape(B, H // 2, 2, W // 2, 2, C).mean(axis=(2, 4))


def upsample2_nhwc(x):  # nearest, scale 2
    B, H, W, C = x.shape
    y = jnp.broadcast_to(x[:, :, None, :, None, :], (B, H, 2, W, 2, C))
    return y.reshape(B, 2 * H, 2 * W, C)


def _to_nhwc(x):
    return jnp.transpose(x, (0, 2, 3, 1))


def _to_nchw(x):
    return jnp.transpose(x, (0, 3, 1, 2))


# -----------------------------------------------------------------------------
# OctaveConv module (forward pass), parameters initialized deterministically.
# -----------------------------------------------------------------------------
class OctaveConvPallas:
    def __init__(self, in_channels, out_channels, kernel_size, alpha_in=0.5,
                 alpha_out=0.5, stride=1, padding=0, key=None,
                 compute_dtype=jnp.bfloat16):
        assert stride in (1, 2)
        assert 0 <= alpha_in < 1 and 0 <= alpha_out < 1
        l_in = int(alpha_in * in_channels)
        h_in = in_channels - l_in
        l_out = int(alpha_out * out_channels)
        h_out = out_channels - l_out
        assert h_in > 0 and h_out > 0
        self.stride = stride
        self.padding = padding
        self.k = kernel_size
        self.compute_dtype = compute_dtype   # explicit precision choice (bf16/f32)

        key = jax.random.PRNGKey(0) if key is None else key
        keys = jax.random.split(key, 4)

        def init_w(k, cout, cin):
            if cout == 0 or cin == 0:
                return None
            bound = 1.0 / math.sqrt(cin * kernel_size * kernel_size)
            return jax.random.uniform(k, (cout, cin, kernel_size, kernel_size),
                                      jnp.float32, minval=-bound, maxval=bound)

        # PyTorch (OIHW) weights kept for the reference check.
        self.w_h2h_oihw = init_w(keys[0], h_out, h_in)
        self.w_h2l_oihw = init_w(keys[1], l_out, h_in)
        self.w_l2h_oihw = init_w(keys[2], h_out, l_in)
        self.w_l2l_oihw = init_w(keys[3], l_out, l_in)

        to_hwio = lambda w: None if w is None else jnp.transpose(w, (2, 3, 1, 0))
        self.w_h2h = to_hwio(self.w_h2h_oihw)
        self.w_h2l = to_hwio(self.w_h2l_oihw)
        self.w_l2h = to_hwio(self.w_l2h_oihw)
        self.w_l2l = to_hwio(self.w_l2l_oihw)

    def _conv(self, x, w, addend=None):
        return conv2d_pallas(x, w, self.padding, addend=addend,
                             compute_dtype=self.compute_dtype)

    def __call__(self, x):
        x_h, x_l = x if isinstance(x, tuple) else (x, None)
        x_h = None if x_h is None else _to_nhwc(x_h)
        x_l = None if x_l is None else _to_nhwc(x_l)

        if x_h is not None and self.stride == 2:
            x_h = avgpool2_nhwc(x_h)

        if x_l is None:
            # High-frequency-only input.
            x_h2h = self._conv(x_h, self.w_h2h)
            x_h2l = None
            if self.w_h2l is not None:
                # TODO(synk): fold this avgpool into the h2l conv kernel.
                x_h2l = self._conv(avgpool2_nhwc(x_h), self.w_h2l)
            return (_to_nchw(x_h2h), None if x_h2l is None else _to_nchw(x_h2l))

        # Full (high, low) path.
        x_l2h = None
        if self.w_l2h is not None:
            x_l2h = self._conv(x_l, self.w_l2h)
            if self.stride == 1:
                # TODO(synk): fuse this nearest-2x upsample into the h2h
                # kernel's addend read (half-res addend block + in-kernel
                # duplication) to remove a full-resolution HBM round trip.
                x_l2h = upsample2_nhwc(x_l2h)
        # out_h = conv_h2h(x_h) + x_l2h; the addition is fused in the kernel.
        out_h = self._conv(x_h, self.w_h2h, addend=x_l2h)

        x_h2l = None
        if self.w_h2l is not None:
            # TODO(synk): fold this avgpool into the h2l conv kernel.
            x_h2l = self._conv(avgpool2_nhwc(x_h), self.w_h2l)

        out_l = None
        if self.w_l2l is not None and x_h2l is not None:
            x_ll_in = avgpool2_nhwc(x_l) if self.stride == 2 else x_l
            # out_l = conv_l2l(x_ll_in) + x_h2l; addition fused in the kernel.
            out_l = self._conv(x_ll_in, self.w_l2l, addend=x_h2l)

        return (_to_nchw(out_h), None if out_l is None else _to_nchw(out_l))


# -----------------------------------------------------------------------------
# Pure-JAX (XLA) reference mirroring the PyTorch forward, for verification.
# -----------------------------------------------------------------------------
def _conv_ref(x_nchw, w_oihw, padding):
    return jax.lax.conv_general_dilated(
        x_nchw, w_oihw, window_strides=(1, 1),
        padding=[(padding, padding), (padding, padding)],
        dimension_numbers=("NCHW", "OIHW", "NCHW"))


def _avgpool2_nchw(x):
    B, C, H, W = x.shape
    return x.reshape(B, C, H // 2, 2, W // 2, 2).mean(axis=(3, 5))


def _upsample2_nchw(x):
    B, C, H, W = x.shape
    y = jnp.broadcast_to(x[:, :, :, None, :, None], (B, C, H, 2, W, 2))
    return y.reshape(B, C, 2 * H, 2 * W)


def octave_ref(mod, x_h, x_l):
    x_h = _avgpool2_nchw(x_h) if mod.stride == 2 else x_h
    x_h2h = _conv_ref(x_h, mod.w_h2h_oihw, mod.padding)
    x_h2l = (None if mod.w_h2l_oihw is None
             else _conv_ref(_avgpool2_nchw(x_h), mod.w_h2l_oihw, mod.padding))
    if x_l is None:
        return x_h2h, x_h2l
    x_l2h = _conv_ref(x_l, mod.w_l2h_oihw, mod.padding)
    x_l2h = _upsample2_nchw(x_l2h) if mod.stride == 1 else x_l2h
    x_ll = _avgpool2_nchw(x_l) if mod.stride == 2 else x_l
    x_l2l = _conv_ref(x_ll, mod.w_l2l_oihw, mod.padding)
    out_h = x_h2h + x_l2h
    out_l = x_h2l + x_l2l if (x_h2l is not None and x_l2l is not None) else None
    return out_h, out_l


if __name__ == "__main__":
    # Small config consistent with the module: in=8, out=8, k=3, alpha=0.5,
    # stride=1, padding=1  ->  x_h: (2, 4, 16, 16), x_l: (2, 4, 8, 8) (NCHW).
    B, Cin, Cout, K = 2, 8, 8, 3
    H, W = 16, 16
    key = jax.random.PRNGKey(0)
    k_h, k_l, k_w = jax.random.split(key, 3)
    x_h = jax.random.normal(k_h, (B, Cin // 2, H, W), jnp.float32)
    x_l = jax.random.normal(k_l, (B, Cin // 2, H // 2, W // 2), jnp.float32)

    mod = OctaveConvPallas(Cin, Cout, K, alpha_in=0.5, alpha_out=0.5,
                           stride=1, padding=1, key=k_w)

    out_h, out_l = mod((x_h, x_l))
    out_h = jax.block_until_ready(out_h)
    out_l = jax.block_until_ready(out_l)

    # Verify against a pure-JAX reference of the PyTorch forward.
    ref_h, ref_l = octave_ref(mod, x_h, x_l)
    assert out_h.shape == ref_h.shape and out_l.shape == ref_l.shape
    err_h = float(jnp.max(jnp.abs(out_h - ref_h)))
    err_l = float(jnp.max(jnp.abs(out_l - ref_l)))
    assert err_h < 5e-2 and err_l < 5e-2, (err_h, err_l)

    # Explicitly exercise the multi-tile (row-tiled, halo-block) path as well,
    # since the default tile picker fits these small shapes in a single tile.
    y_tiled = conv2d_pallas(_to_nhwc(x_h), mod.w_h2h, 1, tile_h_override=8)
    y_tiled = jax.block_until_ready(y_tiled)
    y_ref = _to_nhwc(_conv_ref(x_h, mod.w_h2h_oihw, 1))
    err_t = float(jnp.max(jnp.abs(y_tiled - y_ref)))
    assert err_t < 5e-2, err_t

    print("KERNEL_OK")
</pallas_src>

<mosaic_0001>
module attributes {stable_mosaic.version = 11 : i64} {
  func.func @kernel(%arg0: i32, %arg1: i32, %arg2: memref<1x10x40xbf16, #tpu.memory_space<vmem>>, %arg3: memref<3x40x32xbf16, #tpu.memory_space<vmem>>, %arg4: memref<1x8x32xf32, #tpu.memory_space<vmem>>, %arg5: memref<8x32xf32, #tpu.memory_space<vmem>>) attributes {dimension_semantics = [#tpu.dimension_semantics<parallel>, #tpu.dimension_semantics<parallel>], iteration_bounds = array<i64: 2, 1>, scalar_prefetch = 0 : i64, scratch_operands = 1 : i64, tpu.core_type = #tpu.core_type<tc>, window_params = [{transform_indices = @transform_0, window_bounds = array<i64: 1, 10, 40>}, {pipeline_mode = #tpu.pipeline_mode<synchronous>, transform_indices = @transform_1, window_bounds = array<i64: 3, 40, 32>}, {transform_indices = @transform_2, window_bounds = array<i64: 1, 8, 32>}]} {
    %c0 = arith.constant 0 : index
    %c0_0 = arith.constant 0 : index
    %c0_1 = arith.constant 0 : index
    %0 = vector.load %arg2[%c0, %c0_0, %c0_1] : memref<1x10x40xbf16, #tpu.memory_space<vmem>>, vector<1x8x40xbf16>
    %1 = vector.shape_cast %0 : vector<1x8x40xbf16> to vector<8x40xbf16>
    %c0_2 = arith.constant 0 : index
    %c0_3 = arith.constant 0 : index
    %c0_4 = arith.constant 0 : index
    %2 = vector.load %arg3[%c0_2, %c0_3, %c0_4] : memref<3x40x32xbf16, #tpu.memory_space<vmem>>, vector<1x40x32xbf16>
    %3 = vector.shape_cast %2 : vector<1x40x32xbf16> to vector<40x32xbf16>
    %cst = arith.constant dense<0.000000e+00> : vector<8x32xf32>
    %4 = tpu.matmul %1, %3, %cst {dimension_numbers = #tpu.dot_dimension_numbers<[1], [0], [0], [1], [0, 0, 1, 1], [], []>} : vector<8x40xbf16>, vector<40x32xbf16>, vector<8x32xf32> -> vector<8x32xf32>
    %c0_5 = arith.constant 0 : index
    %c0_6 = arith.constant 0 : index
    %5 = vector.load %arg5[%c0_5, %c0_6] : memref<8x32xf32, #tpu.memory_space<vmem>>, vector<8x32xf32>
    tpu.vector_store %arg5[%c0_5, %c0_6], %4 {strides = array<i32>} : memref<8x32xf32, #tpu.memory_space<vmem>>, vector<8x32xf32>,
    %c0_7 = arith.constant 0 : index
    %c0_8 = arith.constant 0 : index
    %6 = vector.load %arg5[%c0_7, %c0_8] : memref<8x32xf32, #tpu.memory_space<vmem>>, vector<8x32xf32>
    %c0_9 = arith.constant 0 : index
    %c1 = arith.constant 1 : index
    %c0_10 = arith.constant 0 : index
    %7 = vector.load %arg2[%c0_9, %c1, %c0_10] : memref<1x10x40xbf16, #tpu.memory_space<vmem>>, vector<1x8x40xbf16>
    %8 = vector.shape_cast %7 : vector<1x8x40xbf16> to vector<8x40xbf16>
    %c1_11 = arith.constant 1 : index
    %c0_12 = arith.constant 0 : index
    %c0_13 = arith.constant 0 : index
    %9 = vector.load %arg3[%c1_11, %c0_12, %c0_13] : memref<3x40x32xbf16, #tpu.memory_space<vmem>>, vector<1x40x32xbf16>
    %10 = vector.shape_cast %9 : vector<1x40x32xbf16> to vector<40x32xbf16>
    %cst_14 = arith.constant dense<0.000000e+00> : vector<8x32xf32>
    %11 = tpu.matmul %8, %10, %cst_14 {dimension_numbers = #tpu.dot_dimension_numbers<[1], [0], [0], [1], [0, 0, 1, 1], [], []>} : vector<8x40xbf16>, vector<40x32xbf16>, vector<8x32xf32> -> vector<8x32xf32>
    %12 = arith.addf %6, %11 : vector<8x32xf32>
    %c0_15 = arith.constant 0 : index
    %c0_16 = arith.constant 0 : index
    %13 = vector.load %arg5[%c0_15, %c0_16] : memref<8x32xf32, #tpu.memory_space<vmem>>, vector<8x32xf32>
    tpu.vector_store %arg5[%c0_15, %c0_16], %12 {strides = array<i32>} : memref<8x32xf32, #tpu.memory_space<vmem>>, vector<8x32xf32>,
    %c0_17 = arith.constant 0 : index
    %c0_18 = arith.constant 0 : index
    %14 = vector.load %arg5[%c0_17, %c0_18] : memref<8x32xf32, #tpu.memory_space<vmem>>, vector<8x32xf32>
    %c0_19 = arith.constant 0 : index
    %c2 = arith.constant 2 : index
    %c0_20 = arith.constant 0 : index
    %15 = vector.load %arg2[%c0_19, %c2, %c0_20] : memref<1x10x40xbf16, #tpu.memory_space<vmem>>, vector<1x8x40xbf16>
    %16 = vector.shape_cast %15 : vector<1x8x40xbf16> to vector<8x40xbf16>
    %c2_21 = arith.constant 2 : index
    %c0_22 = arith.constant 0 : index
    %c0_23 = arith.constant 0 : index
    %17 = vector.load %arg3[%c2_21, %c0_22, %c0_23] : memref<3x40x32xbf16, #tpu.memory_space<vmem>>, vector<1x40x32xbf16>
    %18 = vector.shape_cast %17 : vector<1x40x32xbf16> to vector<40x32xbf16>
    %cst_24 = arith.constant dense<0.000000e+00> : vector<8x32xf32>
    %19 = tpu.matmul %16, %18, %cst_24 {dimension_numbers = #tpu.dot_dimension_numbers<[1], [0], [0], [1], [0, 0, 1, 1], [], []>} : vector<8x40xbf16>, vector<40x32xbf16>, vector<8x32xf32> -> vector<8x32xf32>
    %20 = arith.addf %14, %19 : vector<8x32xf32>
    %c0_25 = arith.constant 0 : index
    %c0_26 = arith.constant 0 : index
    %21 = vector.load %arg5[%c0_25, %c0_26] : memref<8x32xf32, #tpu.memory_space<vmem>>, vector<8x32xf32>
    tpu.vector_store %arg5[%c0_25, %c0_26], %20 {strides = array<i32>} : memref<8x32xf32, #tpu.memory_space<vmem>>, vector<8x32xf32>,
    %c0_27 = arith.constant 0 : index
    %c0_28 = arith.constant 0 : index
    %22 = vector.load %arg5[%c0_27, %c0_28] : memref<8x32xf32, #tpu.memory_space<vmem>>, vector<8x32xf32>
    %c0_29 = arith.constant 0 : index
    %c0_30 = arith.constant 0 : index
    %c0_31 = arith.constant 0 : index
    %23 = vector.load %arg4[%c0_29, %c0_30, %c0_31] : memref<1x8x32xf32, #tpu.memory_space<vmem>>, vector<1x8x32xf32>
    %24 = vector.shape_cast %23 : vector<1x8x32xf32> to vector<8x32xf32>
    %25 = vector.shape_cast %22 : vector<8x32xf32> to vector<1x8x32xf32>
    tpu.vector_store %arg4[%c0_29, %c0_30, %c0_31], %25 {strides = array<i32>} : memref<1x8x32xf32, #tpu.memory_space<vmem>>, vector<1x8x32xf32>,
    return
  }
  func.func @transform_0(%arg0: i32, %arg1: i32) -> (i32, i32, i32) {
    %c0_i32 = arith.constant 0 : i32
    %c0_i32_0 = arith.constant 0 : i32
    return %arg0, %arg1, %c0_i32 : i32, i32, i32
  }
  func.func @transform_1(%arg0: i32, %arg1: i32) -> (i32, i32, i32) {
    %c0_i32 = arith.constant 0 : i32
    %c0_i32_0 = arith.constant 0 : i32
    %c0_i32_1 = arith.constant 0 : i32
    %c0_i32_2 = arith.constant 0 : i32
    return %c0_i32, %c0_i32_0, %c0_i32_1 : i32, i32, i32
  }
  func.func @transform_2(%arg0: i32, %arg1: i32) -> (i32, i32, i32) {
    %c0_i32 = arith.constant 0 : i32
    %c0_i32_0 = arith.constant 0 : i32
    return %arg0, %arg1, %c0_i32 : i32, i32, i32
  }
}

</mosaic_0001>

<bundles_post_ra>
// kernel: tpu_custom_call.1
= control target key start
LH: loop header
LB: loop body
LE: loop exit
PB: predicated region body
PF: predicated region fallthrough
CT: control target
= control target key end

     0   :  { %7 = vsyncpa [#allocation4], 0  ;;  %s894_s0 = inlined_call_operand.vmem [shape: bf16[2,10,40], index: 0, kind: input, shape index: {}]   ;;  %s895_s1 = inlined_call_operand.vmem [shape: bf16[3,40,32], index: 1, kind: input, shape index: {}]   ;;  %s896_s2 = inlined_call_operand.hbm [shape: f32[2,8,32], index: 2, kind: output, shape index: {}]  }
   0x1   :  { %9 = vsyncpa [#allocation4 + $0x1], 0  ;;  %s742_s9 = smov 0   ;;  %s744_s10 = smov 0  }
   0x2   :  { %s746_s11 = smov 0   ;;  %s748_s12 = smov 0  }
   0x3   :  { %s750_s13 = smov 0   ;;  %s752_s14 = smov 0  }
   0x4 LB: > { %s497_s15 = sadd.s32 4294967295, %s722_s14   ;;  %s498_s16 = sadd.s32 4294967294, %s722_s14   ;;  %s722_s14 = sphi %s752_s14, %s15_s14   ;;  %s718_s13 = sphi %s750_s13, %s903_s13   ;;  %s714_s12 = sphi %s748_s12, %s902_s12   ;;  %s710_s11 = sphi %s746_s11, %s901_s11   ;;  %s706_s10 = sphi %s744_s10, %s900_s10   ;;  %s702_s9 = sphi %s742_s9, %s899_s9  }
   0x5   : > { %s27_s17 = sadd.s32 1, %s718_s13  ;;  %s85_s18 = sadd.s32 1, %s710_s11 }
   0x6   : > { %p29_p0 = scmp.ge.s32.totalorder %s27_s17, 2  ;;  %p95_p1 = scmp.ne.s32.totalorder %s710_s11, %s706_s10 }
   0x7   : > { %p96_p2 = scmp.eq.s32.totalorder %s497_s15, 1  ;;  %p101_p3 = scmp.ne.s32.totalorder %s706_s10, %s702_s9 }
   0x8   : > { %s905_s17 = smov (%p29_p0, %s27_s17), 0  ;;  %p102_p5 = scmp.eq.s32.totalorder %s498_s16, 1 }
   0x9   : > { %p782_p4 = por %p96_p2, %p95_p1  ;;  %s80_s20 = ssub.s32 %s718_s13, %s905_s17 }
   0xa   : > { %p501_p6 = scmp.ge.s32.totalorder %s722_s14, 1  ;;  %p83_p7 = scmp.eq.s32.totalorder %s80_s20, 0 }
   0xb   : > { %p789_p8 = por %p102_p5, %p101_p3  ;;  %p136_p9 = scmp.lt.s32.totalorder %s722_s14, 3 }
   0xc   : > { %s795_s22 = scalar_select %p83_p7, %s710_s11, %s85_s18  }
   0xd   : > { %p137_p10 = pnand %p501_p6, %p136_p9 }
   0xe   : > { %v633_v0 = vld [vmem:[%s895_s1] sm:$0xff] (!%p137_p10)   ;;  %v724_v1 = vmov (!%p137_p10), 0.0   ;;  %v634_v2 = vld [vmem:[%s895_s1 + $0x8] sm:$0xff] (!%p137_p10)   ;;  %v635_v3 = vld [vmem:[%s895_s1 + $0x14] sm:$0xff] (!%p137_p10)   ;;  %vm725_vm0 = vmmov (!%p137_p10), 0   ;;  %vm198_vm1 = vcmask (!%p137_p10), 1043456  }
   0xf   : > { %140 = sbr.rel (%p137_p10) target bundleno = 281 (0x119), region = 28  ;;  %546 = vmatprep.subr.bf16.mxu0 (!%p137_p10), %v724_v1  ;;  %556 = vmatprep.subr.bf16.mxu1 (!%p137_p10), %v724_v1  ;;  %v636_v4 = vld [vmem:[%s895_s1 + $0x10] ss:$0 sps:$4 sm:$0xff] (!%p137_p10)   ;;  %v637_v5 = vld [vmem:[%s895_s1 + $0x1c] sm:$0xff] (!%p137_p10)   ;;  %p163_p11 = scmp.lt.s32.totalorder (!%p137_p10), %s714_s12, 1  ;;  %vm194_vm2 = vcmask (!%p137_p10), 326656  }
  0x10   : > { %547 = vmatpush3.bf16.msra.mxu0 (!%p137_p10), %v633_v0  ;;  %552 = vmatprep.mubr.msk.bf16.mxu0 (!%p137_p10), %vm725_vm0, %v724_v1  ;;  %v638_v6 = vld [vmem:[%s895_s1 + $0x24] ss:$0 sps:$4 sm:$0xff] (!%p137_p10)   ;;  %v200_v7 = vsel (!%p137_p10), %vm198_vm1, %v636_v4, 0  ;;  %v639_v9 = vld [vmem:[%s895_s1 + $0x28] sm:$0xff] (!%p137_p10)   ;;  %v641_v14 = vld [vmem:[%s895_s1 + $0x30] sm:$0xff] (!%p137_p10)   ;;  %vm242_vm3 = vcmask (!%p137_p10), 261120  }
  0x11   : > { %548 = vmatprep.subr.bf16.mxu0 (!%p137_p10), %v724_v1  ;;  %557 = vmatpush3.bf16.msra.mxu1 (!%p137_p10), %v635_v3  ;;  %v284_v8 = vsel (!%p137_p10), %vm198_vm1, %v638_v6, 0  ;;  %v642_v16 = vld [vmem:[%s895_s1 + $0x38] ss:$0 sps:$4 sm:$0xff] (!%p137_p10)   ;;  %s159_s28 = sand.u32 (!%p137_p10), 1, %s706_s10   ;;  %s530_s30 = sshll.u32 (!%p137_p10), %s714_s12, 7 }
  0x12   : > { %562 = vmatprep.mubr.msk.bf16.mxu1 (!%p137_p10), %vm725_vm0, %v724_v1  ;;  %558 = vmatprep.subr.bf16.mxu1 (!%p137_p10), %v724_v1  ;;  %v362_v19 = vsel (!%p137_p10), %vm198_vm1, %v642_v16, 0  ;;  %s502_s29 = sshll.u32 (!%p137_p10), %s159_s28, 3 }
  0x13   : > { %s161_s3 = scalar_lea.vmem (!%p137_p10), [#allocation3], %s502_s29 }
  0x14   : > { %549 = vmatpush3.bf16.msra.mxu0 (!%p137_p10), %v634_v2  ;;  %s423_s4 = sshll.u32 (!%p137_p10), %s161_s3, 4  ;;  %s848_s4 = int_to_ptr.vmem [resolvable:$true] %s423_s4 }
  0x15   : > { %550 = vmatprep.subr.bf16.mxu0 (!%p137_p10), %v724_v1  ;;  %559 = vmatpush3.bf16.msra.mxu1 (!%p137_p10), %v637_v5  ;;  %s644_s15 = scalar_lea.vmem (!%p137_p10), %s848_s4, 128 }
  0x16   : > { %s164_s7 = scalar_select %p163_p11, %s714_s12, 1  ;;  %560 = vmatprep.subr.bf16.mxu1 %v724_v1 }
  0x17   : > { %p645_p12 = scmp.ne.s32.totalorder %s848_s4, %s644_s15  ;;  %s726_s12 = smov [#allocation3]  }
  0x18   : > { %s533_s8 = sshll.u32 %s164_s7, 3  ;;  %551 = vmatpush3.bf16.msra.mxu0 %v200_v7  ;;  %s846_s7 = scalar_lea.hbm %s896_s2, %s530_s30 }
  0x19   : > { %s170_s18 = scalar_lea.vmem %s894_s0, %s533_s8  ;;  %566 = vmatprep.subr.bf16.mxu0 %v724_v1  ;;  %561 = vmatpush3.bf16.msra.mxu1 %v284_v8  ;;  %s409_s8 = scalar_lea.sflag [#allocation4], %s159_s28 }
  0x1a   : > { %v173_v10 = vld [vmem:[%s170_s18] sm:$0xf]  ;;  %p646_p13 = pnand %p645_p12, %p782_p4  ;;  %s648_s16 = sshll.u32 %s726_s12, 4  ;;  %s649_s16 = int_to_ptr.vmem [resolvable:$false] %s648_s16 }
  0x1b   : > { %v640_v11 = vld [vmem:[%s170_s18] sm:$0x1f]   ;;  %553 = vmatmul.mubr.msk.bf16.vlgmr.msra.gmra.mrb[0].mxu0 %vm194_vm2, %v173_v10  ;;  %p651_p1 = scmp.lt.s32.totalorder %s848_s4, %s649_s16 }
  0x1c   : > { %v259_v12 = vshrl.u32 %v640_v11, 16  ;;  %v261_v13 = vshll.u32 %v640_v11, 16  ;;  %567 = vmatpush3.bf16.msra.mxu0 %v639_v9  ;;  %572 = vmatprep.mubr.msk.bf16.mxu0 %vm725_vm0, %v724_v1  ;;  %v643_v18 = vld [vmem:[%s170_s18] sm:$0x1e]   ;;  %p647_p0 = pneg %p646_p13  ;;  %s650_s18 = scalar_lea.vmem %s649_s16, 256 }
  0x1d   : > { %568 = vmatprep.subr.bf16.mxu0 %v724_v1  ;;  %v342_v20 = vrot.slane %v643_v18, 1  ;;  %p652_p2 = scmp.lt.s32.totalorder %s650_s18, %s644_s15 }
  0x1e   : > { %v263_v15 = vrot.slane %v261_v13, 1 }
  0x1f   : > { %p653_p3 = por %p652_p2, %p651_p1 }
  0x20   : > { %v264_v17 = vor.u32 %v263_v15, %v259_v12  ;;  %569 = vmatpush3.bf16.msra.mxu0 %v641_v14 }
  0x21   : > { %570 = vmatprep.subr.bf16.mxu0 %v724_v1  ;;  %p654_p5 = pnand %p653_p3, %p647_p0 }
  0x22   : > { %563 = vmatmul.mubr.msk.bf16.vlgmr.msra.gmra.mrb[0].mxu1 %vm194_vm2, %v264_v17 }
  0x24   : > { %571 = vmatpush3.bf16.msra.mxu0 %v362_v19 }
  0x27   : > { %573 = vmatmul.mubr.msk.bf16.vlgmr.msra.gmra.mrb[4].mxu0 %vm194_vm2, %v342_v20 }
  0xee   : > { %v236_v21 = vpop.f32.mrb[0].mxu0 }
  0xef   : > { %243 = vst.msk [vmem:[#allocation2] sm:$0xff] %vm242_vm3, %v236_v21  ;;  %v554_v22 = vpop.f32.mrb[1].mxu0 }
  0xf0   : > { %v239_v23 = vpop.f32.mrb[2].mxu0 }
  0xf1   : > { %v555_v24 = vpop.f32.mrb[3].mxu0 }
  0xf5   : > { %v320_v25 = vpop.f32.mrb[0].mxu1 }
  0xf6   : > { %v564_v26 = vpop.f32.mrb[1].mxu1  ;;  %v244_v27 = vld [vmem:[#allocation2] sm:$0xff] }
  0xf7   : > { %v323_v28 = vpop.f32.mrb[2].mxu1  ;;  %v326_v29 = vadd.f32 %v320_v25, %v244_v27 }
  0xf8   : > { %v565_v30 = vpop.f32.mrb[3].mxu1 }
  0xf9   : > { %327 = vst.msk [vmem:[#allocation2] sm:$0xff] %vm242_vm3, %v326_v29 }
  0xfa   : > { %v398_v31 = vpop.f32.mrb[4].mxu0 }
  0xfb   : > { %v574_v32 = vpop.f32.mrb[5].mxu0 }
  0xfc   : > { %v401_v33 = vpop.f32.mrb[6].mxu0 }
  0xfd   : > { %v575_v34 = vpop.f32.mrb[7].mxu0 }
 0x100   : > { %v328_v35 = vld [vmem:[#allocation2] sm:$0xff] }
 0x101   : > { %v404_v36 = vadd.f32 %v398_v31, %v328_v35 }
 0x103   : > { %405 = vst.msk [vmem:[#allocation2] sm:$0xff] %vm242_vm3, %v404_v36 }
 0x10a   : > { %v406_v37 = vld [vmem:[#allocation2] sm:$0xff] }
 0x10b   : > { %407 = vst.msk [vmem:[%s161_s3] sm:$0xff] %vm242_vm3, %v406_v37 }
 0x10c   : > { %657 = shalt.err (!%p654_p5)
}
 0x10d   : > { %s658_s20 = scalar_lea.hbm %s846_s7, 128  ;;  %s662_s25 = scalar_lea.hbm %s896_s2, 256 }
 0x10e   : > { %p659_p6 = scmp.ne.s32.totalorder %s846_s7, %s658_s20  ;;  %p663_p10 = scmp.lt.u32.totalorder %s846_s7, %s896_s2 }
 0x10f   : > { %p664_p11 = scmp.lt.u32.totalorder %s662_s25, %s658_s20  ;;  %p666_p13 = scmp.lt.u32.totalorder %s658_s20, %s846_s7 }
 0x110   : > { %p660_p7 = pnand %p659_p6, %p782_p4 }
 0x111   : > { %p665_p12 = por %p664_p11, %p663_p10 }
 0x112   : > { %p661_p9 = pneg %p660_p7 }
 0x113   : > { %p667_p0 = por %p666_p13, %p665_p12 }
 0x115   : > { %p668_p1 = pnand %p667_p0, %p661_p9 }
 0x117   : > { %671 = shalt.err (!%p668_p1)
}
 0x118   : > { %576 = dma.vmem_to_hbm [thread:$0]  (%p782_p4), %s848_s4, 128, %s846_s7, %s409_s8  }
 0x119 PF: > { %p582_p2 = scmp.ge.s32.totalorder %s722_s14, 2  ;;  %s435_s28 = sand.u32 1, %s702_s9  }
 0x11a   : > { %s436_s29 = scalar_lea.sflag [#allocation4], %s435_s28 }
 0x11b   : > { %p579_p3 = pnand %p582_p2, %p789_p8 }
 0x11d   : > { %697 = dma.done.wait (!%p579_p3), %s436_s29, 128  }
 0x11e   : > { %699 = vsyncadd (!%p579_p3), %s436_s29, 4294967168  ;;  %s15_s14 = sadd.s32 1, %s722_s14   ;;  %s899_s9 = smov %s706_s10 }
 0x11f   : > { %p12_p5 = scmp.ge.s32.totalorder %s15_s14, 4   ;;  %s900_s10 = smov %s710_s11 }
 0x120   : > { %s901_s11 = smov %s795_s22  ;;  %s902_s12 = smov %s718_s13 }
 0x121   : > { %s903_s13 = smov %s905_s17  ;;  %14 = sbr.rel (!%p12_p5) target bundleno = 4 (0x4), region = 65 }
 0x128   :  { %441 = vsyncpa [#allocation4], 1 }
 0x129   :  { %443 = vsyncpa [#allocation4 + $0x1], 1 }

</bundles_post_ra>
